<compile_context>
chip_gen: v7x
topology: tpu7x:2x2x1
jax: 0.10.0
libtpu: 0.0.40
codegen_flags: <defaults>
</compile_context>

<pallas_src>
import functools
import math

import jax
import jax.numpy as jnp
from jax.experimental import pallas as pl
from jax.experimental.pallas import tpu as pltpu


# ---------------------------------------------------------------------------
# VMEM budget: per-chip capacity with headroom (48 MiB on v7x, 96 MiB v5e/v6e)
# ---------------------------------------------------------------------------

def _vmem_limit_bytes():
    cap = 64 * 1024 * 1024                      # v7x-safe fallback
    try:
        info = pltpu.get_tpu_info()
        cap = int(getattr(info, "vmem_capacity_bytes", cap) or cap)
    except Exception:
        pass
    return (cap * 3) // 4


_VMEM_LIMIT = _vmem_limit_bytes()


def _fit_tile(dim, target, granule):
    """Largest multiple of `granule` that is <= target and divides `dim`.

    Falls back to the full dimension (always a legal block) only when no
    granule-multiple divisor exists (e.g. dim smaller than the granule).
    """
    t = (min(target, dim) // granule) * granule
    while t >= granule:
        if dim % t == 0:
            return t
        t -= granule
    return dim


# ---------------------------------------------------------------------------
# Tiled linear projection kernels: y = x @ W (+ b)
# Output dtype is f32, so we accumulate directly into the resident output block
# (same block index across the K axis) -- no scratch accumulator needed.
# ---------------------------------------------------------------------------

def _linear_kernel(x_ref, w_ref, o_ref):
    @pl.when(pl.program_id(2) == 0)
    def _():
        o_ref[...] = jnp.zeros_like(o_ref)

    o_ref[...] += jnp.dot(x_ref[...], w_ref[...],
                          preferred_element_type=jnp.float32)


def _linear_bias_kernel(x_ref, w_ref, b_ref, o_ref):
    @pl.when(pl.program_id(2) == 0)
    def _():
        # Initialize the resident output tile with the (broadcast) bias.
        o_ref[...] = jnp.broadcast_to(b_ref[...], o_ref.shape).astype(o_ref.dtype)

    o_ref[...] += jnp.dot(x_ref[...], w_ref[...],
                          preferred_element_type=jnp.float32)


def linear(x2d, w, b=None, *, tm=512, tn=512, tk=512):
    """x2d: (R, Din), w: (Din, Dout) [PyTorch weight transposed], optional b: (Dout,)."""
    R, Din = x2d.shape
    Dout = w.shape[1]
    tm = _fit_tile(R, tm, 8)        # sublane dim of x / out
    tn = _fit_tile(Dout, tn, 128)   # lane dim of w / out
    tk = _fit_tile(Din, tk, 128)    # lane dim of x, sublane dim of w
    grid = (R // tm, Dout // tn, Din // tk)

    cost = pl.CostEstimate(
        flops=2 * R * Dout * Din,
        transcendentals=0,
        bytes_accessed=4 * (R * Din + Din * Dout + R * Dout),
    )
    cparams = pltpu.CompilerParams(
        dimension_semantics=("parallel", "parallel", "arbitrary"),
        vmem_limit_bytes=_VMEM_LIMIT,
    )

    if b is None:
        return pl.pallas_call(
            _linear_kernel,
            out_shape=jax.ShapeDtypeStruct((R, Dout), x2d.dtype),
            grid=grid,
            in_specs=[
                pl.BlockSpec((tm, tk), lambda i, j, k: (i, k)),
                pl.BlockSpec((tk, tn), lambda i, j, k: (k, j)),
            ],
            out_specs=pl.BlockSpec((tm, tn), lambda i, j, k: (i, j)),
            compiler_params=cparams,
            cost_estimate=cost,
        )(x2d, w)

    b2 = b.reshape(1, Dout)
    return pl.pallas_call(
        _linear_bias_kernel,
        out_shape=jax.ShapeDtypeStruct((R, Dout), x2d.dtype),
        grid=grid,
        in_specs=[
            pl.BlockSpec((tm, tk), lambda i, j, k: (i, k)),
            pl.BlockSpec((tk, tn), lambda i, j, k: (k, j)),
            pl.BlockSpec((1, tn), lambda i, j, k: (0, j)),
        ],
        out_specs=pl.BlockSpec((tm, tn), lambda i, j, k: (i, j)),
        compiler_params=cparams,
        cost_estimate=cost,
    )(x2d, w, b2)


# ---------------------------------------------------------------------------
# Attention kernel: one (batch, query-tile) per grid step, all heads inside,
# lane-dense (tq, H*D) output block written head-by-head.
# ---------------------------------------------------------------------------

def _attn_kernel(q_ref, kv_ref, o_ref, *, heads, dim_head, scale):
    # q_ref : (1, tq, H*D)   -- query tile, heads packed on lanes
    # kv_ref: (1, M, 2*H*D)  -- to_kv output; first H*D lanes = K, last H*D = V
    # o_ref : (1, tq, H*D)   -- lane-dense output in 'b n (h d)' layout
    inner = heads * dim_head
    q = q_ref[0]      # (tq, inner)
    kv = kv_ref[0]    # (M, 2*inner)

    # Static head unroll; head selection is a VMEM lane slice, no extra HBM pass.
    # TODO(synk): head-major weight layout + batched dot_general would feed the
    #             256-wide MXU better on v6e/v7x for dim_head=64.
    for h in range(heads):
        lo = h * dim_head
        hi = lo + dim_head
        qh = q[:, lo:hi].astype(jnp.float32) * scale   # scale folded into q
        kh = kv[:, lo:hi].astype(jnp.float32)          # (M, D)
        vh = kv[:, inner + lo:inner + hi]              # (M, D)

        # Contract on the shared last dim -> no transposed copy of K for the MXU.
        dots = jax.lax.dot_general(
            qh, kh, (((1,), (1,)), ((), ())),
            preferred_element_type=jnp.float32)        # (tq, M)
        dots = dots - jnp.max(dots, axis=-1, keepdims=True)
        p = jnp.exp(dots)
        inv = pl.reciprocal(jnp.sum(p, axis=-1, keepdims=True))  # exact (tq, 1)
        out_h = jnp.dot(p.astype(vh.dtype), vh,
                        preferred_element_type=jnp.float32) * inv

        # Write this head directly into its lane range of the output tile.
        o_ref[0, :, lo:hi] = out_h.astype(o_ref.dtype)


def attention(q, kv, *, heads, dim_head, scale, tq=256):
    """q: (B, N, H*D), kv: (B, M, 2*H*D) -> (B, N, H*D)."""
    B, N, inner = q.shape
    M = kv.shape[1]
    tq = _fit_tile(N, tq, 8)
    kern = functools.partial(_attn_kernel, heads=heads, dim_head=dim_head, scale=scale)
    cost = pl.CostEstimate(
        flops=4 * B * heads * N * M * dim_head,
        transcendentals=B * heads * N * M,
        bytes_accessed=4 * (q.size + kv.size + B * N * inner),
    )
    return pl.pallas_call(
        kern,
        out_shape=jax.ShapeDtypeStruct((B, N, inner), q.dtype),
        grid=(B, N // tq),
        in_specs=[
            pl.BlockSpec((1, tq, inner), lambda b, qi: (b, qi, 0)),
            pl.BlockSpec((1, M, 2 * inner), lambda b, qi: (b, 0, 0)),
        ],
        out_specs=pl.BlockSpec((1, tq, inner), lambda b, qi: (b, qi, 0)),
        compiler_params=pltpu.CompilerParams(
            dimension_semantics=("parallel", "parallel"),
            vmem_limit_bytes=_VMEM_LIMIT,
        ),
        cost_estimate=cost,
    )(q, kv)


# ---------------------------------------------------------------------------
# CrossAttention module (JAX/Pallas)
# ---------------------------------------------------------------------------

class CrossAttentionPallas:
    def __init__(self, dim, context_dim=None, heads=8, dim_head=64, dropout=0.0,
                 *, key):
        inner_dim = dim_head * heads
        self.heads = heads
        self.dim_head = dim_head
        self.scale = dim_head ** (-0.5)
        self.project_out = not (heads == 1 and dim_head == dim)
        context_dim = dim if context_dim is None else context_dim

        k1, k2, k3, k4 = jax.random.split(key, 4)

        def init_w(k, fan_in, fan_out):
            # PyTorch nn.Linear default init: U(-1/sqrt(fan_in), 1/sqrt(fan_in)).
            # Stored transposed (in, out), so y = x @ W.
            bound = 1.0 / math.sqrt(fan_in)
            return jax.random.uniform(k, (fan_in, fan_out), jnp.float32, -bound, bound)

        self.w_kv = init_w(k1, context_dim, inner_dim * 2)   # to_kv (bias=False)
        self.w_q = init_w(k2, dim, inner_dim)                # to_q  (bias=False)
        if self.project_out:
            self.w_out = init_w(k3, inner_dim, dim)          # to_out Linear (with bias)
            bound = 1.0 / math.sqrt(inner_dim)
            self.b_out = jax.random.uniform(k4, (dim,), jnp.float32, -bound, bound)
        # dropout=0.0 -> identity at inference time.

    def __call__(self, x, context=None):
        context = x if context is None else context
        B, N, dim = x.shape
        M = context.shape[1]
        H, D = self.heads, self.dim_head
        inner = H * D

        # Tiled projection matmuls; stay in (B, L, feature) layout. The kv chunk and
        # the 'b n (h d) -> b h n d' head split happen inside the attention kernel
        # (pure VMEM addressing), so there are no HBM passes for transposes/slices.
        kv = linear(context.reshape(B * M, -1), self.w_kv).reshape(B, M, 2 * inner)
        q = linear(x.reshape(B * N, -1), self.w_q).reshape(B, N, inner)

        out = attention(q, kv, heads=H, dim_head=D, scale=self.scale)  # (B, N, inner)

        if self.project_out:
            out = linear(out.reshape(B * N, inner), self.w_out, self.b_out)
            out = out.reshape(B, N, dim)
        return out


# ---------------------------------------------------------------------------
# Pure-JAX reference for verification (mirrors the PyTorch module)
# ---------------------------------------------------------------------------

def reference_forward(mod, x, context=None):
    context = x if context is None else context
    B, N, dim = x.shape
    M = context.shape[1]
    H, D = mod.heads, mod.dim_head
    inner = H * D
    kv = context @ mod.w_kv
    k, v = kv[..., :inner], kv[..., inner:]
    q = x @ mod.w_q

    def sh(t, L):  # 'b n (h d) -> b h n d'
        return t.reshape(B, L, H, D).transpose(0, 2, 1, 3)

    qh, kh, vh = sh(q, N), sh(k, M), sh(v, M)
    dots = jnp.einsum("bhnd,bhmd->bhnm", qh, kh) * mod.scale
    attn = jax.nn.softmax(dots, axis=-1)
    out = jnp.einsum("bhnm,bhmd->bhnd", attn, vh)
    out = out.transpose(0, 2, 1, 3).reshape(B, N, inner)
    if mod.project_out:
        out = out @ mod.w_out + mod.b_out
    return out


if __name__ == "__main__":
    key = jax.random.PRNGKey(0)
    k_param, k_x, k_ctx = jax.random.split(key, 3)

    B, N, M = 2, 16, 32
    dim, context_dim = 64, 64
    heads, dim_head = 2, 64          # inner_dim = 128 -> lane-dense attention output

    mod = CrossAttentionPallas(dim, context_dim=context_dim,
                               heads=heads, dim_head=dim_head, dropout=0.0,
                               key=k_param)

    x = jax.random.normal(k_x, (B, N, dim), jnp.float32)
    context = jax.random.normal(k_ctx, (B, M, context_dim), jnp.float32)

    out = jax.block_until_ready(mod(x, context))
    ref = reference_forward(mod, x, context)

    assert out.shape == (B, N, dim)
    assert jnp.allclose(out, ref, atol=1e-4, rtol=1e-4), "mismatch vs reference"

    print("KERNEL_OK")
</pallas_src>

<mosaic_0001>
module attributes {stable_mosaic.version = 11 : i64} {
  func.func @_linear_kernel(%arg0: i32, %arg1: i32, %arg2: i32, %arg3: memref<64x64xf32, #tpu.memory_space<vmem>>, %arg4: memref<64x256xf32, #tpu.memory_space<vmem>>, %arg5: memref<64x256xf32, #tpu.memory_space<vmem>>) attributes {dimension_semantics = [#tpu.dimension_semantics<parallel>, #tpu.dimension_semantics<parallel>, #tpu.dimension_semantics<arbitrary>], iteration_bounds = array<i64: 1, 1, 1>, scalar_prefetch = 0 : i64, scratch_operands = 0 : i64, tpu.core_type = #tpu.core_type<tc>, window_params = [{transform_indices = @transform_0, window_bounds = array<i64: 64, 64>}, {transform_indices = @transform_1, window_bounds = array<i64: 64, 256>}, {transform_indices = @transform_2, window_bounds = array<i64: 64, 256>}]} {
    %c0_i32 = arith.constant 0 : i32
    %0 = arith.cmpi eq, %arg2, %c0_i32 : i32
    %1 = arith.extui %0 : i1 to i32
    %c0_i32_0 = arith.constant 0 : i32
    %2 = arith.cmpi ne, %1, %c0_i32_0 : i32
    scf.if %2 {
      %cst_8 = arith.constant 0.000000e+00 : f32
      %9 = vector.broadcast %cst_8 : f32 to vector<64x256xf32>
      %c0_9 = arith.constant 0 : index
      %c0_10 = arith.constant 0 : index
      %10 = vector.load %arg5[%c0_9, %c0_10] : memref<64x256xf32, #tpu.memory_space<vmem>>, vector<64x256xf32>
      tpu.vector_store %arg5[%c0_9, %c0_10], %9 {strides = array<i32>} : memref<64x256xf32, #tpu.memory_space<vmem>>, vector<64x256xf32>,
    } else {
    }
    %c0 = arith.constant 0 : index
    %c0_1 = arith.constant 0 : index
    %3 = vector.load %arg5[%c0, %c0_1] : memref<64x256xf32, #tpu.memory_space<vmem>>, vector<64x256xf32>
    %c0_2 = arith.constant 0 : index
    %c0_3 = arith.constant 0 : index
    %4 = vector.load %arg3[%c0_2, %c0_3] : memref<64x64xf32, #tpu.memory_space<vmem>>, vector<64x64xf32>
    %c0_4 = arith.constant 0 : index
    %c0_5 = arith.constant 0 : index
    %5 = vector.load %arg4[%c0_4, %c0_5] : memref<64x256xf32, #tpu.memory_space<vmem>>, vector<64x256xf32>
    %cst = arith.constant dense<0.000000e+00> : vector<64x256xf32>
    %6 = tpu.matmul %4, %5, %cst {dimension_numbers = #tpu.dot_dimension_numbers<[1], [0], [0], [1], [0, 0, 1, 1], [], []>} : vector<64x64xf32>, vector<64x256xf32>, vector<64x256xf32> -> vector<64x256xf32>
    %7 = arith.addf %3, %6 : vector<64x256xf32>
    %c0_6 = arith.constant 0 : index
    %c0_7 = arith.constant 0 : index
    %8 = vector.load %arg5[%c0_6, %c0_7] : memref<64x256xf32, #tpu.memory_space<vmem>>, vector<64x256xf32>
    tpu.vector_store %arg5[%c0_6, %c0_7], %7 {strides = array<i32>} : memref<64x256xf32, #tpu.memory_space<vmem>>, vector<64x256xf32>,
    return
  }
  func.func @transform_0(%arg0: i32, %arg1: i32, %arg2: i32) -> (i32, i32) {
    %c0_i32 = arith.constant 0 : i32
    return %arg0, %arg2 : i32, i32
  }
  func.func @transform_1(%arg0: i32, %arg1: i32, %arg2: i32) -> (i32, i32) {
    %c0_i32 = arith.constant 0 : i32
    return %arg2, %arg1 : i32, i32
  }
  func.func @transform_2(%arg0: i32, %arg1: i32, %arg2: i32) -> (i32, i32) {
    %c0_i32 = arith.constant 0 : i32
    return %arg0, %arg1 : i32, i32
  }
}

</mosaic_0001>

<bundles_post_ra>
// kernel: tpu_custom_call.1
= control target key start
LH: loop header
LB: loop body
LE: loop exit
PB: predicated region body
PF: predicated region fallthrough
CT: control target
= control target key end

     0   :  { %7 = vsyncpa [#allocation3], 0  ;;  %s473_s0 = inlined_call_operand.hbm [shape: f32[64,64], index: 0, kind: input, shape index: {}]   ;;  %s474_s1 = inlined_call_operand.hbm [shape: f32[64,256], index: 1, kind: input, shape index: {}]   ;;  %s475_s2 = inlined_call_operand.hbm [shape: f32[64,256], index: 2, kind: output, shape index: {}]  }
   0x1   :  { %8 = vsyncpa [#allocation6], 0 }
   0x2   :  { %9 = vsyncpa [#allocation4], 0  ;;  %s400_s9 = smov [#allocation2]   ;;  %s328_s13 = scalar_lea.hbm %s473_s0, 1024 }
   0x3   :  { %s15_s10 = sshll.u32 %s400_s9, 4  ;;  %p329_p0 = scmp.ne.s32.totalorder %s473_s0, %s328_s13  ;;  %s16_s10 = int_to_ptr.vmem [resolvable:$true] %s15_s10 }
   0x4   :  { %p332_p1 = scmp.lt.u32.totalorder %s328_s13, %s473_s0 }
   0x6   :  { %p334_p2 = pnand %p332_p1, %p329_p0 }
   0x8   :  { %337 = shalt.err (!%p334_p2)
}
   0x9   :  { %s338_s18 = scalar_lea.vmem %s16_s10, 1024  ;;  %p343_p4 = scmp.lt.s32.totalorder %s16_s10, %s16_s10 }
   0xa   :  { %p339_p3 = scmp.ne.s32.totalorder %s16_s10, %s338_s18  ;;  %p344_p5 = scmp.lt.s32.totalorder %s338_s18, %s338_s18 }
   0xc   :  { %p345_p6 = por %p344_p5, %p343_p4 }
   0xe   :  { %p346_p7 = pnand %p345_p6, %p339_p3 }
  0x10   :  { %349 = shalt.err (!%p346_p7)
}
  0x11   :  { %s401_s19 = smov 128   ;;  %s402_s20 = smov 8  }
  0x12   :  { %21 = dma.hbm_to_vmem [thread:$0]  %s473_s0, 1024, %s16_s10, [#allocation3], %s401_s19, %s401_s19, %s402_s20  }
  0x13   :  { %s403_s23 = smov [#allocation5]   ;;  %s350_s27 = scalar_lea.hbm %s474_s1, 2048 }
  0x14   :  { %s27_s24 = sshll.u32 %s403_s23, 4  ;;  %p351_p8 = scmp.ne.s32.totalorder %s474_s1, %s350_s27  ;;  %s28_s24 = int_to_ptr.vmem [resolvable:$true] %s27_s24 }
  0x15   :  { %p354_p9 = scmp.lt.u32.totalorder %s350_s27, %s474_s1 }
  0x17   :  { %p356_p10 = pnand %p354_p9, %p351_p8 }
  0x19   :  { %359 = shalt.err (!%p356_p10)
}
  0x1a   :  { %s360_s4 = scalar_lea.vmem %s28_s24, 2048  ;;  %p365_p12 = scmp.lt.s32.totalorder %s28_s24, %s28_s24 }
  0x1b   :  { %p361_p11 = scmp.ne.s32.totalorder %s28_s24, %s360_s4  ;;  %p366_p13 = scmp.lt.s32.totalorder %s360_s4, %s360_s4 }
  0x1d   :  { %p367_p0 = por %p366_p13, %p365_p12 }
  0x1f   :  { %p368_p1 = pnand %p367_p0, %p361_p11 }
  0x21   :  { %371 = shalt.err (!%p368_p1)
}
  0x22   :  { %s404_s0 = smov 256   ;;  %s405_s5 = smov 16  }
  0x23   :  { %33 = dma.hbm_to_vmem [thread:$0]  %s474_s1, 2048, %s28_s24, [#allocation6], %s404_s0, %s404_s0, %s405_s5  }
  0x24   :  { %394 = dma.done.wait [#allocation3], 1024  }
  0x25   :  { %395 = vsyncadd [#allocation3], 4294966272 }
  0x26   :  { %396 = dma.done.wait [#allocation6], 2048  }
  0x27   :  { %397 = vsyncadd [#allocation6], 4294965248  ;;  %v406_v0 = vmov 0.0   ;;  %v85_v1 = vld [vmem:[#allocation5 + $0x8] sm:$0xff]  ;;  %v87_v2 = vld [vmem:[#allocation5 + $0x18] sm:$0xff]  ;;  %vm100_vm0 = vcmask 523264  }
  0x28   :  { %189 = vmatprep.mubr.f32.mxu0 %v406_v0  ;;  %213 = vmatprep.mubr.f32.mxu1 %v406_v0  ;;  %v84_v3 = vld [vmem:[#allocation5] sm:$0xff]  ;;  %v296_v4 = vpack.c.bf16 %v87_v2, %v85_v1  ;;  %v86_v5 = vld [vmem:[#allocation5 + $0x10] sm:$0xff]  ;;  %v89_v6 = vld [vmem:[#allocation5 + $0x28] sm:$0xff]  ;;  %s407_s1 = smov [#allocation7]  }
  0x29   :  { %v91_v7 = vld [vmem:[#allocation5 + $0x38] sm:$0xff]  ;;  %v298_v8 = vpack.c.bf16 %v86_v5, %v84_v3  ;;  %v88_v10 = vld [vmem:[#allocation5 + $0x20] sm:$0xff]  ;;  %v90_v11 = vld [vmem:[#allocation5 + $0x30] sm:$0xff]  ;;  %s275_s8 = sshll.u32 %s407_s1, 4  ;;  %s276_s8 = int_to_ptr.vmem [resolvable:$true] %s275_s8 }
  0x2a   :  { %v300_v9 = vpack.c.bf16 %v91_v7, %v89_v6  ;;  %v93_v12 = vld [vmem:[#allocation5 + $0x48] sm:$0xff]  ;;  %297 = vmatprep.subr.bf16.mxu0 %v296_v4  ;;  %312 = vmatprep.subr.bf16.mxu1 %v296_v4  ;;  %v95_v13 = vld [vmem:[#allocation5 + $0x58] sm:$0xff]  ;;  %v302_v14 = vpack.c.bf16 %v90_v11, %v88_v10  ;;  %v92_v16 = vld [vmem:[#allocation5 + $0x40] sm:$0xff]  ;;  %s372_s9 = scalar_lea.vmem %s276_s8, 2048  ;;  %p377_p3 = scmp.lt.s32.totalorder %s276_s8, %s276_s8 }
  0x2b   :  { %299 = vmatpush1.bf16.msra.mxu0 %v298_v8  ;;  %316 = vmatpush1.bf16.msra.mxu1 %v298_v8  ;;  %v304_v15 = vpack.c.bf16 %v95_v13, %v93_v12  ;;  %v94_v17 = vld [vmem:[#allocation5 + $0x50] sm:$0xff]  ;;  %v97_v18 = vld [vmem:[#allocation5 + $0x68] sm:$0xff]  ;;  %v99_v19 = vld [vmem:[#allocation5 + $0x78] sm:$0xff]  ;;  %p373_p2 = scmp.ne.s32.totalorder %s276_s8, %s372_s9  ;;  %p378_p4 = scmp.lt.s32.totalorder %s372_s9, %s372_s9 }
  0x2c   :  { %301 = vmatprep.subr.bf16.mxu0 %v300_v9  ;;  %313 = vmatprep.subr.bf16.mxu1 %v300_v9  ;;  %v306_v20 = vpack.c.bf16 %v94_v17, %v92_v16  ;;  %v308_v21 = vpack.c.bf16 %v99_v19, %v97_v18  ;;  %v96_v22 = vld [vmem:[#allocation5 + $0x60] sm:$0xff]  ;;  %v98_v23 = vld [vmem:[#allocation5 + $0x70] sm:$0xff]  ;;  %v77_v27 = vld [vmem:[#allocation2 + $0x8] sm:$0xff] }
  0x2d   :  { %v310_v24 = vpack.c.bf16 %v98_v23, %v96_v22  ;;  %v76_v25 = vld [vmem:[#allocation2] sm:$0xff]  ;;  %v81_v28 = vld [vmem:[#allocation2 + $0x28] sm:$0xff]  ;;  %v78_v29 = vld [vmem:[#allocation2 + $0x10] sm:$0xff]  ;;  %p379_p5 = por %p378_p4, %p377_p3 }
  0x2e   :  { %v80_v26 = vld [vmem:[#allocation2 + $0x20] sm:$0xff]  ;;  %v82_v30 = vld [vmem:[#allocation2 + $0x30] sm:$0xff]  ;;  %v79_v31 = vld [vmem:[#allocation2 + $0x18] sm:$0xff] }
  0x2f   :  { %303 = vmatpush1.bf16.msra.mxu0 %v302_v14  ;;  %317 = vmatpush1.bf16.msra.mxu1 %v302_v14  ;;  %v83_v32 = vld [vmem:[#allocation2 + $0x38] sm:$0xff]  ;;  %p380_p6 = pnand %p379_p5, %p373_p2 }
  0x30   :  { %305 = vmatprep.subr.bf16.mxu0 %v304_v15  ;;  %314 = vmatprep.subr.bf16.mxu1 %v304_v15 }
  0x33   :  { %307 = vmatpush1.bf16.msra.mxu0 %v306_v20  ;;  %318 = vmatpush1.bf16.msra.mxu1 %v306_v20 }
  0x34   :  { %309 = vmatprep.subr.bf16.mxu0 %v308_v21  ;;  %315 = vmatprep.subr.bf16.mxu1 %v308_v21 }
  0x37   :  { %311 = vmatpush1.bf16.msra.mxu0 %v310_v24  ;;  %319 = vmatpush1.bf16.msra.mxu1 %v310_v24 }
  0x3a   :  { %288 = vmatmul.mubr.msk.f32.vlgmr.msra.gmra.mrb[0].mxu0 %vm100_vm0, %v76_v25  ;;  %292 = vmatmul.mubr.msk.f32.vlgmr.msra.gmra.mrb[0].mxu1 %vm100_vm0, %v80_v26 }
  0x3b   :  { %195 = vmatprep.mubr.f32.mxu0 %v406_v0  ;;  %219 = vmatprep.mubr.f32.mxu1 %v406_v0 }
  0x3e   :  { %289 = vmatmul.mubr.msk.f32.gmra.mrb[2].mxu0 %vm100_vm0, %v77_v27  ;;  %293 = vmatmul.mubr.msk.f32.gmra.mrb[2].mxu1 %vm100_vm0, %v81_v28 }
  0x3f   :  { %201 = vmatprep.mubr.f32.mxu0 %v406_v0  ;;  %225 = vmatprep.mubr.f32.mxu1 %v406_v0 }
  0x42   :  { %290 = vmatmul.mubr.msk.f32.gmra.mrb[4].mxu0 %vm100_vm0, %v78_v29  ;;  %294 = vmatmul.mubr.msk.f32.gmra.mrb[4].mxu1 %vm100_vm0, %v82_v30 }
  0x43   :  { %207 = vmatprep.mubr.f32.mxu0 %v406_v0  ;;  %231 = vmatprep.mubr.f32.mxu1 %v406_v0 }
  0x46   :  { %291 = vmatmul.mubr.msk.f32.gmra.mrb[6].mxu0 %vm100_vm0, %v79_v31  ;;  %295 = vmatmul.mubr.msk.f32.gmra.mrb[6].mxu1 %vm100_vm0, %v83_v32 }
 0x10d   :  { %v191_v33 = vpop.f32.mrb[0].mxu0  ;;  %v215_v34 = vpop.f32.mrb[0].mxu1 }
 0x10e   :  { %v193_v35 = vpop.f32.mrb[1].mxu0  ;;  %v217_v36 = vpop.f32.mrb[1].mxu1  ;;  %254 = vst [vmem:[#allocation7] sm:$0xff] %v191_v33  ;;  %262 = vst [vmem:[#allocation7 + $0x40] sm:$0xff] %v215_v34 }
 0x10f   :  { %255 = vst [vmem:[#allocation7 + $0x8] sm:$0xff] %v193_v35  ;;  %263 = vst [vmem:[#allocation7 + $0x48] sm:$0xff] %v217_v36 }
 0x111   :  { %v197_v37 = vpop.f32.mrb[2].mxu0  ;;  %v221_v38 = vpop.f32.mrb[2].mxu1 }
 0x112   :  { %v199_v39 = vpop.f32.mrb[3].mxu0  ;;  %v223_v40 = vpop.f32.mrb[3].mxu1  ;;  %256 = vst [vmem:[#allocation7 + $0x10] sm:$0xff] %v197_v37  ;;  %264 = vst [vmem:[#allocation7 + $0x50] sm:$0xff] %v221_v38 }
 0x113   :  { %257 = vst [vmem:[#allocation7 + $0x18] sm:$0xff] %v199_v39  ;;  %265 = vst [vmem:[#allocation7 + $0x58] sm:$0xff] %v223_v40 }
 0x115   :  { %v203_v41 = vpop.f32.mrb[4].mxu0  ;;  %v227_v42 = vpop.f32.mrb[4].mxu1 }
 0x116   :  { %v205_v43 = vpop.f32.mrb[5].mxu0  ;;  %v229_v44 = vpop.f32.mrb[5].mxu1  ;;  %258 = vst [vmem:[#allocation7 + $0x20] sm:$0xff] %v203_v41  ;;  %266 = vst [vmem:[#allocation7 + $0x60] sm:$0xff] %v227_v42 }
 0x117   :  { %259 = vst [vmem:[#allocation7 + $0x28] sm:$0xff] %v205_v43  ;;  %267 = vst [vmem:[#allocation7 + $0x68] sm:$0xff] %v229_v44 }
 0x119   :  { %v209_v45 = vpop.f32.mrb[6].mxu0  ;;  %v233_v46 = vpop.f32.mrb[6].mxu1 }
 0x11a   :  { %v211_v47 = vpop.f32.mrb[7].mxu0  ;;  %v235_v48 = vpop.f32.mrb[7].mxu1  ;;  %260 = vst [vmem:[#allocation7 + $0x30] sm:$0xff] %v209_v45  ;;  %268 = vst [vmem:[#allocation7 + $0x70] sm:$0xff] %v233_v46 }
 0x11b   :  { %261 = vst [vmem:[#allocation7 + $0x38] sm:$0xff] %v211_v47  ;;  %269 = vst [vmem:[#allocation7 + $0x78] sm:$0xff] %v235_v48 }
 0x11c   :  { %383 = shalt.err (!%p380_p6)
}
 0x11d   :  { %s384_s12 = scalar_lea.hbm %s475_s2, 2048 }
 0x11e   :  { %p385_p7 = scmp.ne.s32.totalorder %s475_s2, %s384_s12  ;;  %p388_p8 = scmp.lt.u32.totalorder %s384_s12, %s475_s2 }
 0x120   :  { %p390_p9 = pnand %p388_p8, %p385_p7 }
 0x122   :  { %393 = shalt.err (!%p390_p9)
}
 0x123   :  { %281 = dma.vmem_to_hbm [thread:$0]  %s276_s8, 2048, %s475_s2, [#allocation4], %s404_s0, %s404_s0, %s405_s5  }
 0x124   :  { %398 = dma.done.wait [#allocation4], 2048  }
 0x125   :  { %399 = vsyncadd [#allocation4], 4294965248 }
 0x126   :  { %285 = vsyncpa [#allocation3], 1 }
 0x127   :  { %286 = vsyncpa [#allocation6], 1 }
 0x128   :  { %287 = vsyncpa [#allocation4], 1 }

</bundles_post_ra>
